<compile_context>
chip_gen: v5e
topology: v5e:2x2
jax: 0.10.0
libtpu: 0.0.40
codegen_flags: <defaults>
</compile_context>

<pallas_src>
import jax
import jax.numpy as jnp
from jax.experimental import pallas as pl
from jax.experimental.pallas import tpu as pltpu

SUB = 8       # sublane tile
LANE = 128    # lane tile
BM_CAP = 1024 # max batch rows per grid step (fits comfortably in scoped VMEM
              # on v5e's 16 MiB default; bigger blocks give no extra win here)


def _round_up(n, m):
    return ((n + m - 1) // m) * m


# ----------------------------- Pallas kernel --------------------------------
def combinet_kernel(x_ref, w1_ref, w2_ref, w3_ref, b12_ref, b3_ref, out_ref):
    """qnet forward for one batch block: Linear -> ReLU -> Linear -> ReLU -> Linear.

    Shapes (all lane/sublane padded, zero-filled in the pad region):
      x_ref   : (Bm, Dp)  f32   streamed batch block
      w1_ref  : (Dp, Hp)  bf16  ll1 weight, pre-transposed to (in, out)
      w2_ref  : (Hp, Hp)  bf16  ll2 weight, pre-transposed
      w3_ref  : (Hp, Ap)  bf16  ll3 weight, pre-transposed
      b12_ref : (8, Hp)   f32   row 0 = b1, row 1 = b2
      b3_ref  : (8, Ap)   f32   row 0 = b3
      out_ref : (Bm, Ap)  f32   streamed output block (real logits in [:, :A])
    """
    f32 = jnp.float32
    bf16 = jnp.bfloat16

    x = x_ref[...].astype(bf16)
    b1 = b12_ref[0:1, :]
    b2 = b12_ref[1:2, :]
    b3 = b3_ref[0:1, :]

    z1 = jnp.dot(x, w1_ref[...], preferred_element_type=f32) + b1
    z1 = jnp.maximum(z1, 0.0)
    z2 = jnp.dot(z1.astype(bf16), w2_ref[...], preferred_element_type=f32) + b2
    z2 = jnp.maximum(z2, 0.0)
    out_ref[...] = jnp.dot(z2.astype(bf16), w3_ref[...],
                           preferred_element_type=f32) + b3


# ------------------------------- wrapper -------------------------------------
def make_combinet_forward(params, dtype=jnp.float32):
    """Prepares the padded/transposed bf16 parameter layout ONCE and returns a
    jitted forward(x) that streams the batch through the Pallas kernel."""
    w1, b1 = params["w1"], params["b1"]   # nn.Linear layout: (out, in)
    w2, b2 = params["w2"], params["b2"]
    w3, b3 = params["w3"], params["b3"]

    H, Din = w1.shape
    A = w3.shape[0]
    Dp = max(_round_up(Din, LANE), LANE)
    Hp = max(_round_up(H, LANE), LANE)
    Ap = max(_round_up(A, LANE), LANE)

    def pad2(a, shape):
        return jnp.pad(a, [(0, s - d) for d, s in zip(a.shape, shape)])

    # One-time layout work: transpose to (in, out), zero-pad, cast to bf16.
    w1p = pad2(jnp.asarray(w1, jnp.bfloat16).T, (Dp, Hp))   # (Dp, Hp)
    w2p = pad2(jnp.asarray(w2, jnp.bfloat16).T, (Hp, Hp))   # (Hp, Hp)
    w3p = pad2(jnp.asarray(w3, jnp.bfloat16).T, (Hp, Ap))   # (Hp, Ap)

    b12p = jnp.zeros((SUB, Hp), jnp.float32)
    b12p = b12p.at[0, :H].set(jnp.asarray(b1, jnp.float32))
    b12p = b12p.at[1, :H].set(jnp.asarray(b2, jnp.float32))
    b3p = jnp.zeros((SUB, Ap), jnp.float32)
    b3p = b3p.at[0, :A].set(jnp.asarray(b3, jnp.float32))

    @jax.jit
    def forward(x):
        x = jnp.asarray(x, dtype)
        B = x.shape[0]

        # Pad rows to the sublane tile / columns to the lane tile only if
        # needed (static trace-time check; no per-call pad when aligned).
        Bp = max(_round_up(B, SUB), SUB)
        if Bp != B or Dp != Din:
            x_in = jnp.pad(x, ((0, Bp - B), (0, Dp - Din)))
        else:
            x_in = x

        # Batch block size: whole (padded) batch if small, else BM_CAP rows.
        Bm = Bp if Bp <= BM_CAP else BM_CAP
        grid = (pl.cdiv(Bp, Bm),)

        out = pl.pallas_call(
            combinet_kernel,
            out_shape=jax.ShapeDtypeStruct((Bp, Ap), jnp.float32),
            grid=grid,
            in_specs=[
                pl.BlockSpec((Bm, Dp), lambda i: (i, 0)),    # streamed x
                pl.BlockSpec((Dp, Hp), lambda i: (0, 0)),    # resident w1
                pl.BlockSpec((Hp, Hp), lambda i: (0, 0)),    # resident w2
                pl.BlockSpec((Hp, Ap), lambda i: (0, 0)),    # resident w3
                pl.BlockSpec((SUB, Hp), lambda i: (0, 0)),   # resident b1/b2
                pl.BlockSpec((SUB, Ap), lambda i: (0, 0)),   # resident b3
            ],
            out_specs=pl.BlockSpec((Bm, Ap), lambda i: (i, 0)),
            compiler_params=pltpu.CompilerParams(
                dimension_semantics=("parallel",)),          # megacore on v7x
        )(x_in, w1p, w2p, w3p, b12p, b3p)

        return out[:B, :A]

    return forward


# --------------------------- pure-JAX references ------------------------------
def combinet_reference_f32(x, params):
    z1 = jnp.maximum(x @ params["w1"].T + params["b1"], 0.0)
    z2 = jnp.maximum(z1 @ params["w2"].T + params["b2"], 0.0)
    return z2 @ params["w3"].T + params["b3"]


def combinet_reference_bf16(x, params):
    """Matches the kernel's numerics: bf16 matmul operands, f32 accumulation."""
    bf16, f32 = jnp.bfloat16, jnp.float32

    def lin(a, w, b):
        return jnp.dot(a.astype(bf16), jnp.asarray(w, bf16).T,
                       preferred_element_type=f32) + b

    z1 = jnp.maximum(lin(x, params["w1"], params["b1"]), 0.0)
    z2 = jnp.maximum(lin(z1, params["w2"], params["b2"]), 0.0)
    return lin(z2, params["w3"], params["b3"])


# ---------------------------------- main --------------------------------------
if __name__ == "__main__":
    input_size = 128     # flattened feature vector size fed to qnet
    node_size = 32
    no_actions = 8
    batch = 2

    key = jax.random.PRNGKey(0)
    ks = jax.random.split(key, 8)

    def rnd(k, shape, scale=0.1):
        return (scale * jax.random.normal(k, shape)).astype(jnp.float32)

    params = {
        "w1": rnd(ks[0], (node_size, input_size)),   # nn.Linear layout (out, in)
        "b1": rnd(ks[1], (node_size,)),
        "w2": rnd(ks[2], (node_size, node_size)),
        "b2": rnd(ks[3], (node_size,)),
        "w3": rnd(ks[4], (no_actions, node_size)),
        "b3": rnd(ks[5], (no_actions,)),
    }
    x = rnd(ks[6], (batch, input_size), scale=1.0)

    forward = make_combinet_forward(params)   # layout prep happens exactly once
    out = forward(x)
    jax.block_until_ready(out)

    assert out.shape == (batch, no_actions), f"bad output shape {out.shape}"

    ref_bf16 = combinet_reference_bf16(x, params)
    ref_f32 = combinet_reference_f32(x, params)
    assert jnp.allclose(out, ref_bf16, atol=2e-3, rtol=2e-3), \
        "output mismatch vs bf16-matched reference"
    assert jnp.allclose(out, ref_f32, atol=3e-2, rtol=3e-2), \
        "output mismatch vs f32 reference"

    print("KERNEL_OK")
</pallas_src>

<mosaic_0001>
module attributes {stable_mosaic.version = 11 : i64} {
  func.func @combinet_kernel(%arg0: i32, %arg1: memref<8x128xf32, #tpu.memory_space<vmem>>, %arg2: memref<128x128xbf16, #tpu.memory_space<vmem>>, %arg3: memref<128x128xbf16, #tpu.memory_space<vmem>>, %arg4: memref<128x128xbf16, #tpu.memory_space<vmem>>, %arg5: memref<8x128xf32, #tpu.memory_space<vmem>>, %arg6: memref<8x128xf32, #tpu.memory_space<vmem>>, %arg7: memref<8x128xf32, #tpu.memory_space<vmem>>) attributes {dimension_semantics = [#tpu.dimension_semantics<parallel>], iteration_bounds = array<i64: 1>, scalar_prefetch = 0 : i64, scratch_operands = 0 : i64, tpu.core_type = #tpu.core_type<tc>, window_params = [{transform_indices = @transform_0, window_bounds = array<i64: 8, 128>}, {pipeline_mode = #tpu.pipeline_mode<synchronous>, transform_indices = @transform_1, window_bounds = array<i64: 128, 128>}, {pipeline_mode = #tpu.pipeline_mode<synchronous>, transform_indices = @transform_2, window_bounds = array<i64: 128, 128>}, {pipeline_mode = #tpu.pipeline_mode<synchronous>, transform_indices = @transform_3, window_bounds = array<i64: 128, 128>}, {pipeline_mode = #tpu.pipeline_mode<synchronous>, transform_indices = @transform_4, window_bounds = array<i64: 8, 128>}, {pipeline_mode = #tpu.pipeline_mode<synchronous>, transform_indices = @transform_5, window_bounds = array<i64: 8, 128>}, {transform_indices = @transform_6, window_bounds = array<i64: 8, 128>}]} {
    %c0 = arith.constant 0 : index
    %c0_0 = arith.constant 0 : index
    %0 = vector.load %arg1[%c0, %c0_0] : memref<8x128xf32, #tpu.memory_space<vmem>>, vector<8x128xf32>
    %1 = arith.truncf %0 : vector<8x128xf32> to vector<8x128xbf16>
    %c0_1 = arith.constant 0 : index
    %c0_2 = arith.constant 0 : index
    %2 = vector.load %arg5[%c0_1, %c0_2] : memref<8x128xf32, #tpu.memory_space<vmem>>, vector<1x128xf32>
    %c1 = arith.constant 1 : index
    %c0_3 = arith.constant 0 : index
    %3 = vector.load %arg5[%c1, %c0_3] : memref<8x128xf32, #tpu.memory_space<vmem>>, vector<1x128xf32>
    %c0_4 = arith.constant 0 : index
    %c0_5 = arith.constant 0 : index
    %4 = vector.load %arg6[%c0_4, %c0_5] : memref<8x128xf32, #tpu.memory_space<vmem>>, vector<1x128xf32>
    %c0_6 = arith.constant 0 : index
    %c0_7 = arith.constant 0 : index
    %5 = vector.load %arg2[%c0_6, %c0_7] : memref<128x128xbf16, #tpu.memory_space<vmem>>, vector<128x128xbf16>
    %cst = arith.constant dense<0.000000e+00> : vector<8x128xf32>
    %6 = tpu.matmul %1, %5, %cst {dimension_numbers = #tpu.dot_dimension_numbers<[1], [0], [0], [1], [0, 0, 1, 1], [], []>} : vector<8x128xbf16>, vector<128x128xbf16>, vector<8x128xf32> -> vector<8x128xf32>
    %7 = vector.broadcast %2 : vector<1x128xf32> to vector<8x128xf32>
    %8 = arith.addf %6, %7 : vector<8x128xf32>
    %cst_8 = arith.constant 0.000000e+00 : f32
    %9 = vector.broadcast %cst_8 : f32 to vector<8x128xf32>
    %10 = arith.maximumf %8, %9 : vector<8x128xf32>
    %11 = arith.truncf %10 : vector<8x128xf32> to vector<8x128xbf16>
    %c0_9 = arith.constant 0 : index
    %c0_10 = arith.constant 0 : index
    %12 = vector.load %arg3[%c0_9, %c0_10] : memref<128x128xbf16, #tpu.memory_space<vmem>>, vector<128x128xbf16>
    %cst_11 = arith.constant dense<0.000000e+00> : vector<8x128xf32>
    %13 = tpu.matmul %11, %12, %cst_11 {dimension_numbers = #tpu.dot_dimension_numbers<[1], [0], [0], [1], [0, 0, 1, 1], [], []>} : vector<8x128xbf16>, vector<128x128xbf16>, vector<8x128xf32> -> vector<8x128xf32>
    %14 = vector.broadcast %3 : vector<1x128xf32> to vector<8x128xf32>
    %15 = arith.addf %13, %14 : vector<8x128xf32>
    %cst_12 = arith.constant 0.000000e+00 : f32
    %16 = vector.broadcast %cst_12 : f32 to vector<8x128xf32>
    %17 = arith.maximumf %15, %16 : vector<8x128xf32>
    %18 = arith.truncf %17 : vector<8x128xf32> to vector<8x128xbf16>
    %c0_13 = arith.constant 0 : index
    %c0_14 = arith.constant 0 : index
    %19 = vector.load %arg4[%c0_13, %c0_14] : memref<128x128xbf16, #tpu.memory_space<vmem>>, vector<128x128xbf16>
    %cst_15 = arith.constant dense<0.000000e+00> : vector<8x128xf32>
    %20 = tpu.matmul %18, %19, %cst_15 {dimension_numbers = #tpu.dot_dimension_numbers<[1], [0], [0], [1], [0, 0, 1, 1], [], []>} : vector<8x128xbf16>, vector<128x128xbf16>, vector<8x128xf32> -> vector<8x128xf32>
    %21 = vector.broadcast %4 : vector<1x128xf32> to vector<8x128xf32>
    %22 = arith.addf %20, %21 : vector<8x128xf32>
    %c0_16 = arith.constant 0 : index
    %c0_17 = arith.constant 0 : index
    %23 = vector.load %arg7[%c0_16, %c0_17] : memref<8x128xf32, #tpu.memory_space<vmem>>, vector<8x128xf32>
    tpu.vector_store %arg7[%c0_16, %c0_17], %22 {strides = array<i32>} : memref<8x128xf32, #tpu.memory_space<vmem>>, vector<8x128xf32>,
    return
  }
  func.func @transform_0(%arg0: i32) -> (i32, i32) {
    %c0_i32 = arith.constant 0 : i32
    %c0_i32_0 = arith.constant 0 : i32
    return %arg0, %c0_i32 : i32, i32
  }
  func.func @transform_1(%arg0: i32) -> (i32, i32) {
    %c0_i32 = arith.constant 0 : i32
    %c0_i32_0 = arith.constant 0 : i32
    %c0_i32_1 = arith.constant 0 : i32
    return %c0_i32, %c0_i32_0 : i32, i32
  }
  func.func @transform_2(%arg0: i32) -> (i32, i32) {
    %c0_i32 = arith.constant 0 : i32
    %c0_i32_0 = arith.constant 0 : i32
    %c0_i32_1 = arith.constant 0 : i32
    return %c0_i32, %c0_i32_0 : i32, i32
  }
  func.func @transform_3(%arg0: i32) -> (i32, i32) {
    %c0_i32 = arith.constant 0 : i32
    %c0_i32_0 = arith.constant 0 : i32
    %c0_i32_1 = arith.constant 0 : i32
    return %c0_i32, %c0_i32_0 : i32, i32
  }
  func.func @transform_4(%arg0: i32) -> (i32, i32) {
    %c0_i32 = arith.constant 0 : i32
    %c0_i32_0 = arith.constant 0 : i32
    %c0_i32_1 = arith.constant 0 : i32
    return %c0_i32, %c0_i32_0 : i32, i32
  }
  func.func @transform_5(%arg0: i32) -> (i32, i32) {
    %c0_i32 = arith.constant 0 : i32
    %c0_i32_0 = arith.constant 0 : i32
    %c0_i32_1 = arith.constant 0 : i32
    return %c0_i32, %c0_i32_0 : i32, i32
  }
  func.func @transform_6(%arg0: i32) -> (i32, i32) {
    %c0_i32 = arith.constant 0 : i32
    %c0_i32_0 = arith.constant 0 : i32
    return %arg0, %c0_i32 : i32, i32
  }
}

</mosaic_0001>

<bundles_post_ra>
// kernel: forward.1
= control target key start
LH: loop header
LB: loop body
LE: loop exit
PB: predicated region body
PF: predicated region fallthrough
CT: control target
= control target key end

     0   :  { %11 = vsyncpa [#allocation3], 0  ;;  %s628_s0 = inlined_call_operand.vmem [shape: f32[8,128], index: 0, kind: input, shape index: {}]   ;;  %s629_s1 = inlined_call_operand.hbm [shape: bf16[128,128], index: 1, kind: input, shape index: {}]   ;;  %s630_s2 = inlined_call_operand.hbm [shape: bf16[128,128], index: 2, kind: input, shape index: {}]   ;;  %s631_s3 = inlined_call_operand.hbm [shape: bf16[128,128], index: 3, kind: input, shape index: {}]   ;;  %s632_s4 = inlined_call_operand.hbm [shape: f32[8,128], index: 4, kind: input, shape index: {}]   ;;  %s633_s5 = inlined_call_operand.vmem [shape: f32[8,128], index: 5, kind: input, shape index: {}]   ;;  %s634_s6 = inlined_call_operand.vmem [shape: f32[8,128], index: 6, kind: output, shape index: {}]  }
   0x1   :  { %12 = vsyncpa [#allocation5], 0 }
   0x2   :  { %13 = vsyncpa [#allocation8], 0  ;;  %s33_s23 = sshll.u32 %s630_s2, 4  ;;  %s566_s24 = smov [#allocation4]   ;;  %s34_s23 = int_to_ptr.hbm [resolvable:$true] %s33_s23 }
   0x3   :  { %s35_s25 = sshll.u32 %s566_s24, 4  ;;  %s20_s28 = sshll.u32 %s629_s1, 4  ;;  %s36_s25 = int_to_ptr.vmem [resolvable:$true] %s35_s25  ;;  %s21_s28 = int_to_ptr.hbm [resolvable:$true] %s20_s28 }
   0x4   :  { %s567_s29 = smov 64   ;;  %s568_s30 = smov 4  }
   0x5   :  { %41 = dma.hbm_to_vmem [thread:$0]  %s34_s23, 1024, %s36_s25, [#allocation5], %s567_s29, %s567_s29, %s568_s30  }
   0x6   :  { %s569_s7 = smov [#allocation2]   ;;  %s46_s11 = sshll.u32 %s631_s3, 4  ;;  %s47_s11 = int_to_ptr.hbm [resolvable:$true] %s46_s11 }
   0x7   :  { %s22_s8 = sshll.u32 %s569_s7, 4  ;;  %s60_s13 = sshll.u32 %s632_s4, 4  ;;  %s23_s8 = int_to_ptr.vmem [resolvable:$true] %s22_s8  ;;  %s61_s13 = int_to_ptr.hbm [resolvable:$true] %s60_s13 }
   0x8   :  { %28 = dma.hbm_to_vmem [thread:$0]  %s21_s28, 1024, %s23_s8, [#allocation3], %s567_s29, %s567_s29, %s568_s30  }
   0x9   :  { %s570_s14 = smov [#allocation6]   ;;  %s571_s1 = smov [#allocation7]  }
   0xa   :  { %s48_s15 = sshll.u32 %s570_s14, 4  ;;  %s62_s16 = sshll.u32 %s571_s1, 4  ;;  %s49_s15 = int_to_ptr.vmem [resolvable:$true] %s48_s15  ;;  %s63_s16 = int_to_ptr.vmem [resolvable:$true] %s62_s16 }
   0xb   :  { %54 = dma.hbm_to_vmem [thread:$0]  %s47_s11, 1024, %s49_s15, [#allocation5], %s567_s29, %s567_s29, %s568_s30  }
   0xc   :  { %65 = dma.hbm_to_vmem [thread:$0]  %s61_s13, 128, %s63_s16, [#allocation8]  }
   0xd   :  { %560 = dma.done.wait [#allocation3], 1024  }
   0xe   :  { %561 = vsyncadd [#allocation3], 4294966272 }
   0xf   :  { %562 = dma.done.wait [#allocation5], 2048  }
  0x10   :  { %563 = vsyncadd [#allocation5], 4294965248 }
  0x11   :  { %564 = dma.done.wait [#allocation8], 128  }
  0x12   :  { %565 = vsyncadd [#allocation8], 4294967168  ;;  %v438_v0 = vld [vmem:[#allocation2 + $0x38] sm:$0xff]  ;;  %v437_v1 = vld [vmem:[#allocation2 + $0x30] sm:$0xff] }
  0x13   :  { %154 = vmatpush.bf16.msra.mxu0 %v438_v0  ;;  %v446_v2 = vld [vmem:[#allocation4 + $0x38] sm:$0xff]  ;;  %v445_v3 = vld [vmem:[#allocation4 + $0x30] sm:$0xff]  ;;  %v436_v4 = vld [vmem:[#allocation2 + $0x28] sm:$0xff] }
  0x14   :  { %234 = vmatpush.bf16.msra.mxu1 %v446_v2  ;;  %v444_v5 = vld [vmem:[#allocation4 + $0x28] sm:$0xff]  ;;  %v435_v6 = vld [vmem:[#allocation2 + $0x20] sm:$0xff]  ;;  %v434_v8 = vld [vmem:[#allocation2 + $0x18] sm:$0xff] }
  0x15   :  { %v443_v7 = vld [vmem:[#allocation4 + $0x20] sm:$0xff]  ;;  %v442_v9 = vld [vmem:[#allocation4 + $0x18] sm:$0xff]  ;;  %v433_v10 = vld [vmem:[#allocation2 + $0x10] sm:$0xff] }
  0x16   :  { %v441_v11 = vld [vmem:[#allocation4 + $0x10] sm:$0xff]  ;;  %v432_v12 = vld [vmem:[#allocation2 + $0x8] sm:$0xff]  ;;  %v431_v13 = vld [vmem:[#allocation2] sm:$0xff] }
  0x17   :  { %155 = vmatpush.bf16.msra.mxu0 %v437_v1  ;;  %v84_v14 = vld [vmem:[%s628_s0] sm:$0xff]  ;;  %v440_v16 = vld [vmem:[#allocation4 + $0x8] sm:$0xff]  ;;  %v454_v18 = vld [vmem:[#allocation6 + $0x38] sm:$0xff] }
  0x18   :  { %235 = vmatpush.bf16.msra.mxu1 %v445_v3  ;;  %v85_v15 = vpack.c.bf16 %v84_v14, %v84_v14  ;;  %v439_v17 = vld [vmem:[#allocation4] sm:$0xff]  ;;  %314 = vmatpush.bf16.msra.mxu2 %v454_v18  ;;  %v453_v19 = vld [vmem:[#allocation6 + $0x30] sm:$0xff]  ;;  %v452_v20 = vld [vmem:[#allocation6 + $0x28] sm:$0xff] }
  0x19   :  { %v451_v21 = vld [vmem:[#allocation6 + $0x20] sm:$0xff]  ;;  %v450_v22 = vld [vmem:[#allocation6 + $0x18] sm:$0xff]  ;;  %v449_v23 = vld [vmem:[#allocation6 + $0x10] sm:$0xff] }
  0x1a   :  { %v461_v24 = vld [vmem:[#allocation7] ss:$0 sm:$0xff]  ;;  %v448_v30 = vld [vmem:[#allocation6 + $0x8] sm:$0xff]  ;;  %v462_v32 = vld [vmem:[#allocation7 + $0x1] ss:$0 sm:$0xff] }
  0x1b   :  { %156 = vmatpush.bf16.msra.mxu0 %v436_v4  ;;  %v447_v31 = vld [vmem:[#allocation6] sm:$0xff] }
  0x1c   :  { %236 = vmatpush.bf16.msra.mxu1 %v444_v5  ;;  %315 = vmatpush.bf16.msra.mxu2 %v453_v19  ;;  %v463_v38 = vld [vmem:[%s633_s5] ss:$0 sm:$0xff] }
  0x1f   :  { %157 = vmatpush.bf16.msra.mxu0 %v435_v6 }
  0x20   :  { %237 = vmatpush.bf16.msra.mxu1 %v443_v7  ;;  %316 = vmatpush.bf16.msra.mxu2 %v452_v20 }
  0x23   :  { %158 = vmatpush.bf16.msra.mxu0 %v434_v8 }
  0x24   :  { %238 = vmatpush.bf16.msra.mxu1 %v442_v9  ;;  %317 = vmatpush.bf16.msra.mxu2 %v451_v21 }
  0x27   :  { %159 = vmatpush.bf16.msra.mxu0 %v433_v10 }
  0x28   :  { %239 = vmatpush.bf16.msra.mxu1 %v441_v11  ;;  %318 = vmatpush.bf16.msra.mxu2 %v450_v22 }
  0x2b   :  { %160 = vmatpush.bf16.msra.mxu0 %v432_v12 }
  0x2c   :  { %240 = vmatpush.bf16.msra.mxu1 %v440_v16  ;;  %319 = vmatpush.bf16.msra.mxu2 %v449_v23 }
  0x2f   :  { %161 = vmatpush.bf16.msra.mxu0 %v431_v13 }
  0x30   :  { %241 = vmatpush.bf16.msra.mxu1 %v439_v17  ;;  %320 = vmatpush.bf16.msra.mxu2 %v448_v30 }
  0x32   :  { %162 = vmatmul.bf16.vlgmr.msra.gmra.mxu0 %v85_v15 }
  0x34   :  { %321 = vmatpush.bf16.msra.mxu2 %v447_v31 }
  0xaf   :  { %v163_v25 = vpop.f32.mrf.mxu0 }
  0xb0   :  { %v164_v26 = vadd.f32 %v461_v24, %v163_v25 }
  0xb2   :  { %v167_v27 = vmax.f32 %v164_v26, 0.0 }
  0xb4   :  { %v168_v28 = vpack.c.bf16 %v167_v27, %v167_v27 }
  0xb6   :  { %242 = vmatmul.bf16.vlgmr.msra.gmra.mxu1 %v168_v28 }
  0xb7   :  { %v165_v29 = vpop.f32.mrf.mxu0 }
 0x133   :  { %v243_v33 = vpop.f32.mrf.mxu1 }
 0x134   :  { %v244_v34 = vadd.f32 %v462_v32, %v243_v33 }
 0x136   :  { %v247_v35 = vmax.f32 %v244_v34, 0.0 }
 0x138   :  { %v248_v36 = vpack.c.bf16 %v247_v35, %v247_v35 }
 0x13a   :  { %322 = vmatmul.bf16.vlgmr.msra.gmra.mxu2 %v248_v36 }
 0x13b   :  { %v245_v37 = vpop.f32.mrf.mxu1 }
 0x1bd   :  { %v323_v39 = vpop.f32.mrf.mxu2 }
 0x1be   :  { %v324_v40 = vadd.f32 %v463_v38, %v323_v39 }
 0x1c0   :  { %327 = vst [vmem:[%s634_s6] sm:$0xff] %v324_v40 }
 0x1c5   :  { %v325_v41 = vpop.f32.mrf.mxu2 }
 0x1c6   :  { %332 = vsyncpa [#allocation3], 1 }
 0x1c7   :  { %333 = vsyncpa [#allocation5], 1 }
 0x1c8   :  { %334 = vsyncpa [#allocation8], 1 }

</bundles_post_ra>
